<compile_context>
chip_gen: v5e
topology: v5e:2x2
jax: 0.10.0
libtpu: 0.0.40
codegen_flags: <defaults>
</compile_context>

<pallas_src>
import functools

import jax
import jax.numpy as jnp
from jax import lax
from jax.experimental import pallas as pl
from jax.experimental.pallas import tpu as pltpu

LANE = 128


def _round_up(n, m=LANE):
    return ((n + m - 1) // m) * m


# ---------------------------------------------------------------------------
# Fused Pallas kernel: gc1 -> relu -> gc2 -> relu -> gc3 -> log_softmax
# ---------------------------------------------------------------------------

def gcn_fused_kernel(x_ref, z_ref, adj_v_ref, adj_e_ref, t_ref,
                     w1_ref, p1_ref, b1_ref,
                     w2_ref, p2_ref, b2_ref,
                     w3_ref, p3_ref, b3_ref,
                     logp_ref, nodef_ref, edgef_ref,
                     *, nclass):
    f32 = jnp.float32
    x = x_ref[...]            # (Nv, Fv)
    z = z_ref[...]            # (Ne, Fe)
    adj_v = adj_v_ref[...]    # (Nv, Nv)
    adj_e = adj_e_ref[...]    # (Ne, Ne)
    t = t_ref[...]            # (Nv, Ne)
    nv, ne = t.shape

    # Diagonal masks built once and shared between gc1 and gc3.
    diag_v = (lax.broadcasted_iota(jnp.int32, (nv, nv), 0)
              == lax.broadcasted_iota(jnp.int32, (nv, nv), 1))
    diag_e = (lax.broadcasted_iota(jnp.int32, (ne, ne), 0)
              == lax.broadcasted_iota(jnp.int32, (ne, ne), 1))

    # A @ B^T without materializing B^T: contract the last axis of both operands.
    ddt = (((1,), (1,)), ((), ()))

    def matmul_t(a, b):
        return lax.dot_general(a, b, dimension_numbers=ddt,
                               preferred_element_type=f32)

    def mm(a, b):
        return jnp.dot(a, b, preferred_element_type=f32)

    # ---- gc1: node layer --------------------------------------------------
    d1 = matmul_t(p1_ref[...], z)                        # (1, Ne) == (H_e @ p^T)^T
    m1 = jnp.where(diag_v, 1.0, matmul_t(t * d1, t))     # T diag(d1) T^T, diag -> 1
    adj_a1 = m1 * adj_v
    x1 = mm(adj_a1, mm(x, w1_ref[...])) + b1_ref[...]    # (Nv, HID_P)
    nodef_ref[...] = x1                                  # lane-dense store

    xr = jnp.maximum(x1, 0.0)
    zr = jnp.maximum(z, 0.0)
    # dropout: eval-mode identity

    # ---- gc2: edge layer --------------------------------------------------
    d2 = matmul_t(p2_ref[...], xr)                       # (1, Nv) == (H_v @ p^T)^T
    tt = t.T                                             # single small transpose (Ne, Nv)
    m2 = jnp.where(diag_e, 1.0, matmul_t(tt * d2, tt))   # T^T diag(d2) T, diag -> 1
    adj_a2 = m2 * adj_e
    z2 = mm(adj_a2, mm(zr, w2_ref[...])) + b2_ref[...]   # (Ne, FE_P)
    edgef_ref[...] = z2                                  # lane-dense store

    zr2 = jnp.maximum(z2, 0.0)
    xr2 = xr        # edge layer passes node features through; relu is idempotent

    # ---- gc3: node layer --------------------------------------------------
    d3 = matmul_t(p3_ref[...], zr2)                      # (1, Ne)
    m3 = jnp.where(diag_v, 1.0, matmul_t(t * d3, t))
    adj_a3 = m3 * adj_v
    logits = mm(adj_a3, mm(xr2, w3_ref[...])) + b3_ref[...]   # (Nv, NC_P)

    # ---- fused log_softmax over the first `nclass` (real) lanes ------------
    col = lax.broadcasted_iota(jnp.int32, logits.shape, 1)
    valid = col < nclass
    neg = jnp.float32(-1e30)
    mx = jnp.max(jnp.where(valid, logits, neg), axis=1, keepdims=True)
    s = logits - mx
    es = jnp.exp(jnp.where(valid, s, neg))               # exp(-1e30) == 0 in padded lanes
    lse = jnp.log(jnp.sum(es, axis=1, keepdims=True))
    logp_ref[...] = jnp.where(valid, s - lse, 0.0)       # lane-dense store


# ---------------------------------------------------------------------------
# Wrapper: pad params to lane-dense widths, single pallas_call, slice outputs
# ---------------------------------------------------------------------------

_VMEM = pl.BlockSpec(memory_space=pltpu.MemorySpace.VMEM)


def gcn_forward(params, X, Z, adj_e, adj_v, T):
    # TODO(synk): training-mode dropout (F.dropout) is modeled as eval-mode identity.
    Nv, _ = X.shape
    Ne, nfeat_e = Z.shape
    nhid = params["gc1"]["W"].shape[1]
    nclass = params["gc3"]["W"].shape[1]

    hid_p = _round_up(nhid)
    fe_p = _round_up(nfeat_e)
    nc_p = _round_up(nclass)

    def pad_cols(a, width):
        return jnp.pad(a, ((0, 0), (0, width - a.shape[1])))

    def pad_rows(a, height):
        return jnp.pad(a, ((0, height - a.shape[0]), (0, 0)))

    # Zero-pad weights / biases / gating vectors so every kernel output slab is
    # lane-dense (last dim a multiple of 128).  Padded columns stay exactly 0, so
    # logical results are unchanged; the wrapper slices them away.
    w1 = pad_cols(params["gc1"]["W"], hid_p)
    b1 = pad_cols(params["gc1"]["b"], hid_p)
    p1 = params["gc1"]["p"]

    w2 = pad_cols(params["gc2"]["W"], fe_p)
    b2 = pad_cols(params["gc2"]["b"], fe_p)
    p2 = pad_cols(params["gc2"]["p"], hid_p)

    w3 = pad_cols(pad_rows(params["gc3"]["W"], hid_p), nc_p)
    b3 = pad_cols(params["gc3"]["b"], nc_p)
    p3 = pad_cols(params["gc3"]["p"], fe_p)

    kernel = functools.partial(gcn_fused_kernel, nclass=nclass)
    logp_p, nodef_p, edgef_p = pl.pallas_call(
        kernel,
        out_shape=(jax.ShapeDtypeStruct((Nv, nc_p), jnp.float32),
                   jax.ShapeDtypeStruct((Nv, hid_p), jnp.float32),
                   jax.ShapeDtypeStruct((Ne, fe_p), jnp.float32)),
        in_specs=[_VMEM] * 14,
        out_specs=(_VMEM, _VMEM, _VMEM),
    )(X, Z, adj_v, adj_e, T, w1, p1, b1, w2, p2, b2, w3, p3, b3)

    return (logp_p[:, :nclass], nodef_p[:, :nhid], edgef_p[:, :nfeat_e])


# ---------------------------------------------------------------------------
# Params + pure-JAX reference (for correctness check)
# ---------------------------------------------------------------------------

def init_params(key, nfeat_v, nfeat_e, nhid, nclass):
    ks = jax.random.split(key, 9)

    def w(k, shape, scale=0.1):
        return (scale * jax.random.normal(k, shape)).astype(jnp.float32)

    return {
        # gc1: node layer  (in_v=nfeat_v -> out_v=nhid), p over edge feats
        "gc1": {"W": w(ks[0], (nfeat_v, nhid)),
                "p": w(ks[1], (1, nfeat_e)),
                "b": w(ks[2], (1, nhid))},
        # gc2: edge layer  (in_e=nfeat_e -> out_e=nfeat_e), p over node feats (nhid)
        "gc2": {"W": w(ks[3], (nfeat_e, nfeat_e)),
                "p": w(ks[4], (1, nhid)),
                "b": w(ks[5], (1, nfeat_e))},
        # gc3: node layer  (in_v=nhid -> out_v=nclass), p over edge feats
        "gc3": {"W": w(ks[6], (nhid, nclass)),
                "p": w(ks[7], (1, nfeat_e)),
                "b": w(ks[8], (1, nclass))},
    }


def gcn_reference(params, X, Z, adj_e, adj_v, T):
    def node_layer(Hv, He, adj, W, p, b):
        d = (He @ p.T)[:, 0]
        mult = (T * d[None, :]) @ T.T
        eye = jnp.eye(mult.shape[0], dtype=mult.dtype)
        m = eye + (1.0 - eye) * mult
        return (m * adj) @ (Hv @ W) + b

    def edge_layer(Hv, He, adj, W, p, b):
        d = (Hv @ p.T)[:, 0]
        mult = (T.T * d[None, :]) @ T
        eye = jnp.eye(mult.shape[0], dtype=mult.dtype)
        m = eye + (1.0 - eye) * mult
        return (m * adj) @ (He @ W) + b

    x1 = node_layer(X, Z, adj_v, **params["gc1"])
    node_feature = x1
    Xr, Zr = jax.nn.relu(x1), jax.nn.relu(Z)
    z2 = edge_layer(Xr, Zr, adj_e, **params["gc2"])
    edge_feature = z2
    Xr2, Zr2 = jax.nn.relu(Xr), jax.nn.relu(z2)
    x3 = node_layer(Xr2, Zr2, adj_v, **params["gc3"])
    return jax.nn.log_softmax(x3, axis=1), node_feature, edge_feature


# ---------------------------------------------------------------------------
# main
# ---------------------------------------------------------------------------

if __name__ == "__main__":
    key = jax.random.PRNGKey(0)
    k_x, k_z, k_av, k_ae, k_t, k_p = jax.random.split(key, 6)

    Nv, Ne = 16, 24            # nodes, edges
    nfeat_v, nfeat_e = 8, 8
    nhid, nclass = 32, 4

    X = jax.random.normal(k_x, (Nv, nfeat_v), dtype=jnp.float32)
    Z = jax.random.normal(k_z, (Ne, nfeat_e), dtype=jnp.float32)

    # symmetric binary adjacencies and a 0/1 incidence matrix
    av = (jax.random.uniform(k_av, (Nv, Nv)) < 0.3).astype(jnp.float32)
    adj_v = jnp.maximum(av, av.T)
    ae = (jax.random.uniform(k_ae, (Ne, Ne)) < 0.3).astype(jnp.float32)
    adj_e = jnp.maximum(ae, ae.T)
    T = (jax.random.uniform(k_t, (Nv, Ne)) < 0.2).astype(jnp.float32)

    params = init_params(k_p, nfeat_v, nfeat_e, nhid, nclass)

    logp, node_feat, edge_feat = gcn_forward(params, X, Z, adj_e, adj_v, T)
    jax.block_until_ready((logp, node_feat, edge_feat))

    assert logp.shape == (Nv, nclass)
    assert node_feat.shape == (Nv, nhid)
    assert edge_feat.shape == (Ne, nfeat_e)
    # rows of log_softmax must exp-sum to 1
    assert bool(jnp.allclose(jnp.sum(jnp.exp(logp), axis=1), 1.0, atol=1e-4))

    # pure-JAX reference check of the fused kernel
    ref_logp, ref_nf, ref_ef = gcn_reference(params, X, Z, adj_e, adj_v, T)
    assert bool(jnp.allclose(logp, ref_logp, atol=5e-3, rtol=5e-3))
    assert bool(jnp.allclose(node_feat, ref_nf, atol=5e-3, rtol=5e-3))
    assert bool(jnp.allclose(edge_feat, ref_ef, atol=5e-3, rtol=5e-3))

    print("KERNEL_OK")
</pallas_src>

<mosaic_0001>
module attributes {stable_mosaic.version = 11 : i64} {
  func.func @gcn_fused_kernel(%arg0: memref<16x8xf32, #tpu.memory_space<vmem>>, %arg1: memref<24x8xf32, #tpu.memory_space<vmem>>, %arg2: memref<16x16xf32, #tpu.memory_space<vmem>>, %arg3: memref<24x24xf32, #tpu.memory_space<vmem>>, %arg4: memref<16x24xf32, #tpu.memory_space<vmem>>, %arg5: memref<8x128xf32, #tpu.memory_space<vmem>>, %arg6: memref<1x8xf32, #tpu.memory_space<vmem>>, %arg7: memref<1x128xf32, #tpu.memory_space<vmem>>, %arg8: memref<8x128xf32, #tpu.memory_space<vmem>>, %arg9: memref<1x128xf32, #tpu.memory_space<vmem>>, %arg10: memref<1x128xf32, #tpu.memory_space<vmem>>, %arg11: memref<128x128xf32, #tpu.memory_space<vmem>>, %arg12: memref<1x128xf32, #tpu.memory_space<vmem>>, %arg13: memref<1x128xf32, #tpu.memory_space<vmem>>, %arg14: memref<16x128xf32, #tpu.memory_space<vmem>>, %arg15: memref<16x128xf32, #tpu.memory_space<vmem>>, %arg16: memref<24x128xf32, #tpu.memory_space<vmem>>) attributes {dimension_semantics = [], scalar_prefetch = 0 : i64, scratch_operands = 0 : i64, tpu.core_type = #tpu.core_type<tc>} {
    %c0 = arith.constant 0 : index
    %c0_0 = arith.constant 0 : index
    %0 = vector.load %arg0[%c0, %c0_0] : memref<16x8xf32, #tpu.memory_space<vmem>>, vector<16x8xf32>
    %c0_1 = arith.constant 0 : index
    %c0_2 = arith.constant 0 : index
    %1 = vector.load %arg1[%c0_1, %c0_2] : memref<24x8xf32, #tpu.memory_space<vmem>>, vector<24x8xf32>
    %c0_3 = arith.constant 0 : index
    %c0_4 = arith.constant 0 : index
    %2 = vector.load %arg2[%c0_3, %c0_4] : memref<16x16xf32, #tpu.memory_space<vmem>>, vector<16x16xf32>
    %c0_5 = arith.constant 0 : index
    %c0_6 = arith.constant 0 : index
    %3 = vector.load %arg3[%c0_5, %c0_6] : memref<24x24xf32, #tpu.memory_space<vmem>>, vector<24x24xf32>
    %c0_7 = arith.constant 0 : index
    %c0_8 = arith.constant 0 : index
    %4 = vector.load %arg4[%c0_7, %c0_8] : memref<16x24xf32, #tpu.memory_space<vmem>>, vector<16x24xf32>
    %5 = tpu.iota {dimensions = array<i32: 0>} : vector<16x16xi32>
    %6 = tpu.iota {dimensions = array<i32: 1>} : vector<16x16xi32>
    %7 = arith.cmpi eq, %5, %6 : vector<16x16xi32>
    %8 = tpu.iota {dimensions = array<i32: 0>} : vector<24x24xi32>
    %9 = tpu.iota {dimensions = array<i32: 1>} : vector<24x24xi32>
    %10 = arith.cmpi eq, %8, %9 : vector<24x24xi32>
    %c0_9 = arith.constant 0 : index
    %c0_10 = arith.constant 0 : index
    %11 = vector.load %arg6[%c0_9, %c0_10] : memref<1x8xf32, #tpu.memory_space<vmem>>, vector<1x8xf32>
    %cst = arith.constant dense<0.000000e+00> : vector<1x24xf32>
    %12 = tpu.matmul %11, %1, %cst {dimension_numbers = #tpu.dot_dimension_numbers<[1], [1], [0], [0], [0, 0, 1, 0], [], []>} : vector<1x8xf32>, vector<24x8xf32>, vector<1x24xf32> -> vector<1x24xf32>
    %13 = vector.broadcast %12 : vector<1x24xf32> to vector<16x24xf32>
    %14 = arith.mulf %4, %13 : vector<16x24xf32>
    %cst_11 = arith.constant dense<0.000000e+00> : vector<16x16xf32>
    %15 = tpu.matmul %14, %4, %cst_11 {dimension_numbers = #tpu.dot_dimension_numbers<[1], [1], [0], [0], [0, 0, 1, 0], [], []>} : vector<16x24xf32>, vector<16x24xf32>, vector<16x16xf32> -> vector<16x16xf32>
    %cst_12 = arith.constant 1.000000e+00 : f32
    %16 = vector.broadcast %cst_12 : f32 to vector<16x16xf32>
    %17 = arith.select %7, %16, %15 : vector<16x16xi1>, vector<16x16xf32>
    %18 = arith.mulf %17, %2 : vector<16x16xf32>
    %c0_13 = arith.constant 0 : index
    %c0_14 = arith.constant 0 : index
    %19 = vector.load %arg5[%c0_13, %c0_14] : memref<8x128xf32, #tpu.memory_space<vmem>>, vector<8x128xf32>
    %cst_15 = arith.constant dense<0.000000e+00> : vector<16x128xf32>
    %20 = tpu.matmul %0, %19, %cst_15 {dimension_numbers = #tpu.dot_dimension_numbers<[1], [0], [0], [1], [0, 0, 1, 1], [], []>} : vector<16x8xf32>, vector<8x128xf32>, vector<16x128xf32> -> vector<16x128xf32>
    %cst_16 = arith.constant dense<0.000000e+00> : vector<16x128xf32>
    %21 = tpu.matmul %18, %20, %cst_16 {dimension_numbers = #tpu.dot_dimension_numbers<[1], [0], [0], [1], [0, 0, 1, 1], [], []>} : vector<16x16xf32>, vector<16x128xf32>, vector<16x128xf32> -> vector<16x128xf32>
    %c0_17 = arith.constant 0 : index
    %c0_18 = arith.constant 0 : index
    %22 = vector.load %arg7[%c0_17, %c0_18] : memref<1x128xf32, #tpu.memory_space<vmem>>, vector<1x128xf32>
    %23 = vector.broadcast %22 : vector<1x128xf32> to vector<16x128xf32>
    %24 = arith.addf %21, %23 : vector<16x128xf32>
    %c0_19 = arith.constant 0 : index
    %c0_20 = arith.constant 0 : index
    %25 = vector.load %arg15[%c0_19, %c0_20] : memref<16x128xf32, #tpu.memory_space<vmem>>, vector<16x128xf32>
    tpu.vector_store %arg15[%c0_19, %c0_20], %24 {strides = array<i32>} : memref<16x128xf32, #tpu.memory_space<vmem>>, vector<16x128xf32>,
    %cst_21 = arith.constant 0.000000e+00 : f32
    %26 = vector.broadcast %cst_21 : f32 to vector<16x128xf32>
    %27 = arith.maximumf %24, %26 : vector<16x128xf32>
    %cst_22 = arith.constant 0.000000e+00 : f32
    %28 = vector.broadcast %cst_22 : f32 to vector<24x8xf32>
    %29 = arith.maximumf %1, %28 : vector<24x8xf32>
    %c0_23 = arith.constant 0 : index
    %c0_24 = arith.constant 0 : index
    %30 = vector.load %arg9[%c0_23, %c0_24] : memref<1x128xf32, #tpu.memory_space<vmem>>, vector<1x128xf32>
    %cst_25 = arith.constant dense<0.000000e+00> : vector<1x16xf32>
    %31 = tpu.matmul %30, %27, %cst_25 {dimension_numbers = #tpu.dot_dimension_numbers<[1], [1], [0], [0], [0, 0, 1, 0], [], []>} : vector<1x128xf32>, vector<16x128xf32>, vector<1x16xf32> -> vector<1x16xf32>
    %32 = tpu.transpose %4, [1, 0] : vector<16x24xf32> -> vector<24x16xf32>
    %33 = vector.broadcast %31 : vector<1x16xf32> to vector<24x16xf32>
    %34 = arith.mulf %32, %33 : vector<24x16xf32>
    %cst_26 = arith.constant dense<0.000000e+00> : vector<24x24xf32>
    %35 = tpu.matmul %34, %32, %cst_26 {dimension_numbers = #tpu.dot_dimension_numbers<[1], [1], [0], [0], [0, 0, 1, 0], [], []>} : vector<24x16xf32>, vector<24x16xf32>, vector<24x24xf32> -> vector<24x24xf32>
    %cst_27 = arith.constant 1.000000e+00 : f32
    %36 = vector.broadcast %cst_27 : f32 to vector<24x24xf32>
    %37 = arith.select %10, %36, %35 : vector<24x24xi1>, vector<24x24xf32>
    %38 = arith.mulf %37, %3 : vector<24x24xf32>
    %c0_28 = arith.constant 0 : index
    %c0_29 = arith.constant 0 : index
    %39 = vector.load %arg8[%c0_28, %c0_29] : memref<8x128xf32, #tpu.memory_space<vmem>>, vector<8x128xf32>
    %cst_30 = arith.constant dense<0.000000e+00> : vector<24x128xf32>
    %40 = tpu.matmul %29, %39, %cst_30 {dimension_numbers = #tpu.dot_dimension_numbers<[1], [0], [0], [1], [0, 0, 1, 1], [], []>} : vector<24x8xf32>, vector<8x128xf32>, vector<24x128xf32> -> vector<24x128xf32>
    %cst_31 = arith.constant dense<0.000000e+00> : vector<24x128xf32>
    %41 = tpu.matmul %38, %40, %cst_31 {dimension_numbers = #tpu.dot_dimension_numbers<[1], [0], [0], [1], [0, 0, 1, 1], [], []>} : vector<24x24xf32>, vector<24x128xf32>, vector<24x128xf32> -> vector<24x128xf32>
    %c0_32 = arith.constant 0 : index
    %c0_33 = arith.constant 0 : index
    %42 = vector.load %arg10[%c0_32, %c0_33] : memref<1x128xf32, #tpu.memory_space<vmem>>, vector<1x128xf32>
    %43 = vector.broadcast %42 : vector<1x128xf32> to vector<24x128xf32>
    %44 = arith.addf %41, %43 : vector<24x128xf32>
    %c0_34 = arith.constant 0 : index
    %c0_35 = arith.constant 0 : index
    %45 = vector.load %arg16[%c0_34, %c0_35] : memref<24x128xf32, #tpu.memory_space<vmem>>, vector<24x128xf32>
    tpu.vector_store %arg16[%c0_34, %c0_35], %44 {strides = array<i32>} : memref<24x128xf32, #tpu.memory_space<vmem>>, vector<24x128xf32>,
    %cst_36 = arith.constant 0.000000e+00 : f32
    %46 = vector.broadcast %cst_36 : f32 to vector<24x128xf32>
    %47 = arith.maximumf %44, %46 : vector<24x128xf32>
    %c0_37 = arith.constant 0 : index
    %c0_38 = arith.constant 0 : index
    %48 = vector.load %arg12[%c0_37, %c0_38] : memref<1x128xf32, #tpu.memory_space<vmem>>, vector<1x128xf32>
    %cst_39 = arith.constant dense<0.000000e+00> : vector<1x24xf32>
    %49 = tpu.matmul %48, %47, %cst_39 {dimension_numbers = #tpu.dot_dimension_numbers<[1], [1], [0], [0], [0, 0, 1, 0], [], []>} : vector<1x128xf32>, vector<24x128xf32>, vector<1x24xf32> -> vector<1x24xf32>
    %50 = vector.broadcast %49 : vector<1x24xf32> to vector<16x24xf32>
    %51 = arith.mulf %4, %50 : vector<16x24xf32>
    %cst_40 = arith.constant dense<0.000000e+00> : vector<16x16xf32>
    %52 = tpu.matmul %51, %4, %cst_40 {dimension_numbers = #tpu.dot_dimension_numbers<[1], [1], [0], [0], [0, 0, 1, 0], [], []>} : vector<16x24xf32>, vector<16x24xf32>, vector<16x16xf32> -> vector<16x16xf32>
    %cst_41 = arith.constant 1.000000e+00 : f32
    %53 = vector.broadcast %cst_41 : f32 to vector<16x16xf32>
    %54 = arith.select %7, %53, %52 : vector<16x16xi1>, vector<16x16xf32>
    %55 = arith.mulf %54, %2 : vector<16x16xf32>
    %c0_42 = arith.constant 0 : index
    %c0_43 = arith.constant 0 : index
    %56 = vector.load %arg11[%c0_42, %c0_43] : memref<128x128xf32, #tpu.memory_space<vmem>>, vector<128x128xf32>
    %cst_44 = arith.constant dense<0.000000e+00> : vector<16x128xf32>
    %57 = tpu.matmul %27, %56, %cst_44 {dimension_numbers = #tpu.dot_dimension_numbers<[1], [0], [0], [1], [0, 0, 1, 1], [], []>} : vector<16x128xf32>, vector<128x128xf32>, vector<16x128xf32> -> vector<16x128xf32>
    %cst_45 = arith.constant dense<0.000000e+00> : vector<16x128xf32>
    %58 = tpu.matmul %55, %57, %cst_45 {dimension_numbers = #tpu.dot_dimension_numbers<[1], [0], [0], [1], [0, 0, 1, 1], [], []>} : vector<16x16xf32>, vector<16x128xf32>, vector<16x128xf32> -> vector<16x128xf32>
    %c0_46 = arith.constant 0 : index
    %c0_47 = arith.constant 0 : index
    %59 = vector.load %arg13[%c0_46, %c0_47] : memref<1x128xf32, #tpu.memory_space<vmem>>, vector<1x128xf32>
    %60 = vector.broadcast %59 : vector<1x128xf32> to vector<16x128xf32>
    %61 = arith.addf %58, %60 : vector<16x128xf32>
    %62 = tpu.iota {dimensions = array<i32: 1>} : vector<16x128xi32>
    %c4_i32 = arith.constant 4 : i32
    %63 = vector.broadcast %c4_i32 : i32 to vector<16x128xi32>
    %64 = arith.cmpi slt, %62, %63 : vector<16x128xi32>
    %cst_48 = arith.constant -1.000000e+30 : f32
    %65 = vector.broadcast %cst_48 : f32 to vector<16x128xf32>
    %66 = arith.select %64, %61, %65 : vector<16x128xi1>, vector<16x128xf32>
    %cst_49 = arith.constant dense<0xFF800000> : vector<16xf32>
    %67 = vector.multi_reduction <maximumf>, %66, %cst_49 [1] : vector<16x128xf32> to vector<16xf32>
    %68 = vector.shape_cast %67 : vector<16xf32> to vector<16x1xf32>
    %69 = vector.broadcast %68 : vector<16x1xf32> to vector<16x128xf32>
    %70 = arith.subf %61, %69 : vector<16x128xf32>
    %cst_50 = arith.constant -1.000000e+30 : f32
    %71 = vector.broadcast %cst_50 : f32 to vector<16x128xf32>
    %72 = arith.select %64, %70, %71 : vector<16x128xi1>, vector<16x128xf32>
    %73 = math.exp %72 : vector<16x128xf32>
    %cst_51 = arith.constant dense<0.000000e+00> : vector<16xf32>
    %74 = vector.multi_reduction <add>, %73, %cst_51 [1] : vector<16x128xf32> to vector<16xf32>
    %75 = vector.shape_cast %74 : vector<16xf32> to vector<16x1xf32>
    %76 = math.log %75 : vector<16x1xf32>
    %77 = vector.broadcast %76 : vector<16x1xf32> to vector<16x128xf32>
    %78 = arith.subf %70, %77 : vector<16x128xf32>
    %cst_52 = arith.constant 0.000000e+00 : f32
    %79 = vector.broadcast %cst_52 : f32 to vector<16x128xf32>
    %80 = arith.select %64, %78, %79 : vector<16x128xi1>, vector<16x128xf32>
    %c0_53 = arith.constant 0 : index
    %c0_54 = arith.constant 0 : index
    %81 = vector.load %arg14[%c0_53, %c0_54] : memref<16x128xf32, #tpu.memory_space<vmem>>, vector<16x128xf32>
    tpu.vector_store %arg14[%c0_53, %c0_54], %80 {strides = array<i32>} : memref<16x128xf32, #tpu.memory_space<vmem>>, vector<16x128xf32>,
    return
  }
}

</mosaic_0001>

<bundles_post_ra>
// kernel: tpu_custom_call.1
= control target key start
LH: loop header
LB: loop body
LE: loop exit
PB: predicated region body
PF: predicated region fallthrough
CT: control target
= control target key end

     0   :  { %s1146_s0 = inlined_call_operand.vmem [shape: f32[16,8], index: 0, kind: input, shape index: {}]   ;;  %s1147_s1 = inlined_call_operand.vmem [shape: f32[24,8], index: 1, kind: input, shape index: {}]   ;;  %s1148_s2 = inlined_call_operand.vmem [shape: f32[16,16], index: 2, kind: input, shape index: {}]   ;;  %s1149_s3 = inlined_call_operand.vmem [shape: f32[24,24], index: 3, kind: input, shape index: {}]   ;;  %s1150_s4 = inlined_call_operand.hbm [shape: f32[16,24], index: 4, kind: input, shape index: {}]   ;;  %s1151_s5 = inlined_call_operand.vmem [shape: f32[8,128], index: 5, kind: input, shape index: {}]   ;;  %s1152_s6 = inlined_call_operand.vmem [shape: f32[1,8], index: 6, kind: input, shape index: {}]   ;;  %s1153_s7 = inlined_call_operand.vmem [shape: f32[1,128], index: 7, kind: input, shape index: {}]   ;;  %s1154_s8 = inlined_call_operand.hbm [shape: f32[8,128], index: 8, kind: input, shape index: {}]   ;;  %s1155_s9 = inlined_call_operand.vmem [shape: f32[1,128], index: 9, kind: input, shape index: {}]   ;;  %s1156_s10 = inlined_call_operand.vmem [shape: f32[1,128], index: 10, kind: input, shape index: {}]   ;;  %s1157_s11 = inlined_call_operand.hbm [shape: f32[128,128], index: 11, kind: input, shape index: {}]   ;;  %s1158_s12 = inlined_call_operand.vmem [shape: f32[1,128], index: 12, kind: input, shape index: {}]   ;;  %s1159_s13 = inlined_call_operand.vmem [shape: f32[1,128], index: 13, kind: input, shape index: {}]   ;;  %s1160_s14 = inlined_call_operand.hbm [shape: f32[16,128], index: 14, kind: output, shape index: {0}]   ;;  %s1161_s15 = inlined_call_operand.hbm [shape: f32[16,128], index: 15, kind: output, shape index: {1}]   ;;  %s1162_s16 = inlined_call_operand.hbm [shape: f32[24,128], index: 16, kind: output, shape index: {2}]  }
   0x1   :  { %1164 = sst [smem:[#allocation16_spill]] %s1146_s0 }
   0x2   :  { %22 = vsyncpa [#allocation3], 0 }
   0x3   :  { %23 = vsyncpa [#allocation6], 0 }
   0x4   :  { %24 = vsyncpa [#allocation4], 0  ;;  %s58_s23 = sshll.u32 %s1154_s8, 4  ;;  %s59_s23 = int_to_ptr.hbm [resolvable:$true] %s58_s23 }
   0x5   :  { %25 = vsyncpa [#allocation10], 0  ;;  %s869_s24 = smov [#allocation5]   ;;  %s38_s28 = sshll.u32 %s1150_s4, 4  ;;  %s39_s28 = int_to_ptr.hbm [resolvable:$true] %s38_s28 }
   0x6   :  { %s60_s25 = sshll.u32 %s869_s24, 4  ;;  %s870_s29 = smov [#allocation2]   ;;  %s61_s25 = int_to_ptr.vmem [resolvable:$true] %s60_s25 }
   0x7   :  { %63 = dma.hbm_to_vmem [thread:$0]  %s59_s23, 128, %s61_s25, [#allocation6]  }
   0x8   :  { %s40_s30 = sshll.u32 %s870_s29, 4  ;;  %s871_s0 = smov 128   ;;  %s41_s30 = int_to_ptr.vmem [resolvable:$true] %s40_s30 }
   0x9   :  { %s872_s17 = smov 8   ;;  %s72_s19 = sshll.u32 %s1157_s11, 4  ;;  %s73_s19 = int_to_ptr.hbm [resolvable:$true] %s72_s19 }
   0xa   :  { %46 = dma.hbm_to_vmem [thread:$0]  %s39_s28, 256, %s41_s30, [#allocation3], %s871_s0, %s871_s0, %s872_s17  }
   0xb   :  { %s873_s20 = smov [#allocation7]  }
   0xc   :  { %s74_s21 = sshll.u32 %s873_s20, 4  ;;  %s75_s21 = int_to_ptr.vmem [resolvable:$true] %s74_s21 }
   0xd   :  { %80 = dma.hbm_to_vmem [thread:$0]  %s73_s19, 2048, %s75_s21, [#allocation6], %s871_s0, %s871_s0, %s872_s17  }
   0xe   :  { %861 = dma.done.wait [#allocation3], 256  }
   0xf   :  { %862 = vsyncadd [#allocation3], 4294967040 }
  0x10   :  { %863 = dma.done.wait [#allocation6], 2176  }
  0x11   :  { %864 = vsyncadd [#allocation6], 4294965120  ;;  %vm119_vm0 = vcmask 64512   ;;  %v980_v0 = vld [vmem:[%s1147_s1 + $0x10] sm:$0xff]  ;;  %v195_v1 = vld [vmem:[%s1151_s5] sm:$0xff]  ;;  %s1165_s28 = sld [smem:[#allocation16_spill]]  ;;  %v109_v24 = vlaneseq }
  0x12   :  { %667 = vmatpush.xpose.msk.msra.mxu1 %vm119_vm0, %v980_v0  ;;  %v100_v2 = vld [vmem:[%s1147_s1 + $0x8] sm:$0xff]  ;;  %217 = vmatpush.msra.mxu2 %v195_v1  ;;  %v994_v4 = vld [vmem:[#allocation2] sm:$0xff]  ;;  %vm155_vm1 = vcmask 195584   ;;  %v373_v16 = vld [vmem:[#allocation5] sm:$0xff]  ;;  %v265_v29 = vmax.f32 %v980_v0, 0.0  ;;  %vm229_vm3 = vcmask 130048  }
  0x13   :  { %287 = vxpose.xlu0.b32.start [1/2] (short) (narrow) %v994_v4, 24  ;;  %v99_v5 = vld [vmem:[%s1147_s1] sm:$0xff]  ;;  %v1001_v6 = vld [vmem:[#allocation2 + $0x8] sm:$0xff]  ;;  %v526_v17 = vld [vmem:[#allocation7 + $0x78] sm:$0xff]  ;;  %398 = vmatpush.msra.mxu0 %v373_v16  ;;  %v264_v21 = vmax.f32 %v100_v2, 0.0  ;;  %v1023_v27 = vshrl.u32 %v109_v24, 7 }
  0x14   :  { %v118_v8 = vld [vmem:[%s1152_s6] sm:$0x1]  ;;  %v263_v15 = vmax.f32 %v99_v5, 0.0  ;;  %v525_v18 = vld [vmem:[#allocation7 + $0x70] sm:$0xff]  ;;  %v523_v20 = vld [vmem:[#allocation7 + $0x60] sm:$0xff]  ;;  %v1025_v28 = vand.u32 127, %v109_v24 }
  0x15   :  { %527 = vmatpush.msrb.mxu0 %v526_v17  ;;  %v524_v19 = vld [vmem:[#allocation7 + $0x68] sm:$0xff]  ;;  %v522_v22 = vld [vmem:[#allocation7 + $0x58] sm:$0xff]  ;;  %v521_v23 = vld [vmem:[#allocation7 + $0x50] sm:$0xff]  ;;  %v1041_v38 = vadd.s32 8, %v1023_v27  ;;  %s631_s18 = sshll.u32 %s1161_s15, 4  ;;  %s875_s19 = smov [#allocation11]   ;;  %s632_s18 = int_to_ptr.hbm [resolvable:$true] %s631_s18 }
  0x16   :  { %668 = vmatpush.xpose.msk.msra.mxu1 %vm119_vm0, %v100_v2  ;;  %685 = vmatmul.msk.f32.vlgmr.msra.gmra.mxu0 %vm119_vm0, %v263_v15  ;;  %v520_v25 = vld [vmem:[#allocation7 + $0x48] sm:$0xff]  ;;  %v519_v26 = vld [vmem:[#allocation7 + $0x40] sm:$0xff]  ;;  %v518_v30 = vld [vmem:[#allocation7 + $0x38] sm:$0xff]  ;;  %vm114_vm2 = vcmp.eq.s32.totalorder %v1023_v27, %v1025_v28  ;;  %vm583_vm6 = vcmp.lt.s32.totalorder %v1025_v28, 4  ;;  %s642_s1 = sshll.u32 %s875_s19, 4  ;;  %s644_s21 = sshll.u32 %s1162_s16, 4  ;;  %s643_s1 = int_to_ptr.vmem [resolvable:$true] %s642_s1  ;;  %s645_s21 = int_to_ptr.hbm [resolvable:$true] %s644_s21 }
  0x17   :  { %v97_v3 = vld [vmem:[%s1165_s28] sm:$0xff]  ;;  %v98_v7 = vld [vmem:[%s1165_s28 + $0x8] sm:$0xff]  ;;  %528 = vmatpush.msrb.mxu0 %v525_v18  ;;  %v515_v36 = vld [vmem:[#allocation7 + $0x20] sm:$0xff]  ;;  %vm115_vm4 = vcmp.eq.s32.totalorder %v1041_v38, %v1025_v28  ;;  %s876_s15 = smov [#allocation8]  }
  0x18   :  { %675 = vmatmul.msk.f32.vlgmr.msra.gmra.mxu2 %vm119_vm0, %v97_v3  ;;  %v517_v31 = vld [vmem:[#allocation7 + $0x30] sm:$0xff]  ;;  %v1033_v32 = vld [vmem:[%s1148_s2] sm:$0xff]  ;;  %v514_v39 = vld [vmem:[#allocation7 + $0x18] sm:$0xff]  ;;  %s616_s16 = sshll.u32 %s876_s15, 4  ;;  %s617_s16 = int_to_ptr.vmem [resolvable:$true] %s616_s16 }
  0x19   :  { %529 = vmatpush.msrb.mxu0 %v524_v19  ;;  %v516_v33 = vld [vmem:[#allocation7 + $0x28] sm:$0xff]  ;;  %v1049_v40 = vld [vmem:[%s1148_s2 + $0x8] sm:$0xff]  ;;  %v511_v46 = vld [vmem:[#allocation7] sm:$0xff] }
  0x1a   :  { %669 = vmatpush.xpose.msk.msra.mxu1 %vm119_vm0, %v99_v5  ;;  %v513_v44 = vld [vmem:[#allocation7 + $0x10] sm:$0xff]  ;;  %v512_v45 = vld [vmem:[#allocation7 + $0x8] sm:$0xff]  ;;  %v106_v15 = vld [vmem:[%s1149_s3 + $0x10] sm:$0xff] }
  0x1b   :  { %288 = vxpose.xlu0.b32.end [2/2] (short) (narrow) %v1001_v6, 24  ;;  %530 = vmatpush.msrb.mxu0 %v523_v20  ;;  %v706_v51 = vld [vmem:[%s1153_s7] ss:$0 sm:$0xff]  ;;  %s618_s7 = sshll.u32 %s1160_s14, 4  ;;  %s619_s7 = int_to_ptr.hbm [resolvable:$true] %s618_s7 }
  0x1c   :  { %v266_v60 = vld [vmem:[%s1155_s9] sm:$0x1] }
  0x1d   :  { %670 = vmatmul.msk.f32.vlgmr.msra.gmra.mxu1 %vm119_vm0, %v118_v8  ;;  %531 = vmatpush.msrb.mxu0 %v522_v22  ;;  %v104_v5 = vld [vmem:[%s1149_s3] sm:$0xff] }
  0x1e   :  { %671 = vmatpush.xpose.msk.msrb.mxu1 %vm155_vm1, %v1001_v6  ;;  %686 = vmatmul.msk.f32.gmra.mxu0 %vm119_vm0, %v264_v21  ;;  %v707_v19 = vld [vmem:[%s1156_s10] ss:$0 sm:$0xff] }
  0x1f   :  { %532 = vmatpush.msrb.mxu0 %v521_v23 }
  0x20   :  { %676 = vmatmul.msk.f32.gmra.mxu2 %vm119_vm0, %v98_v7 }
  0x21   :  { %533 = vmatpush.msrb.mxu0 %v520_v25 }
  0x22   :  { %672 = vmatpush.xpose.msk.msrb.mxu1 %vm155_vm1, %v994_v4 }
  0x23   :  { %534 = vmatpush.msrb.mxu0 %v519_v26 }
  0x25   :  { %535 = vmatpush.msrb.mxu0 %v518_v30 }
  0x26   :  { %687 = vmatmul.msk.f32.gmra.mxu0 %vm119_vm0, %v265_v29 }
  0x27   :  { %536 = vmatpush.msrb.mxu0 %v517_v31  ;;  %v454_v31 = vld [vmem:[%s1158_s12] sm:$0x1] }
  0x29   :  { %537 = vmatpush.msrb.mxu0 %v516_v33 }
  0x2b   :  { %538 = vmatpush.msrb.mxu0 %v515_v36 }
  0x2d   :  { %539 = vmatpush.msrb.mxu0 %v514_v39 }
  0x2f   :  { %540 = vmatpush.msrb.mxu0 %v513_v44 }
  0x31   :  { %541 = vmatpush.msrb.mxu0 %v512_v45 }
  0x33   :  { %542 = vmatpush.msrb.mxu0 %v511_v46 }
  0x93   :  { %v400_v47 = vpop.f32.mrf.mxu0 }
  0x9a   :  { %v149_v10 = vpop.f32.mrf.mxu1 }
  0x9b   :  { %v219_v9 = vpop.f32.mrf.mxu2  ;;  %v152_v11 = vperm.slane %v149_v10, 0  ;;  %v403_v49 = vpop.f32.mrf.mxu0  ;;  %v105_v10 = vld [vmem:[%s1149_s3 + $0x8] sm:$0xff] }
  0x9d   :  { %v153_v12 = vmul.f32 %v152_v11, %v994_v4  ;;  %v154_v14 = vmul.f32 %v152_v11, %v1001_v6 }
  0x9f   :  { %673 = vmatmul.msk.f32.vlgmr.msrb.gmra.mxu1 %vm155_vm1, %v153_v12 }
  0xa3   :  { %v222_v13 = vpop.f32.mrf.mxu2  ;;  %v406_v56 = vpop.f32.mrf.mxu0 }
  0xa4   :  { %250 = vmatpush.msra.mxu3 %v222_v13  ;;  %435 = vmatpush.msra.mxu1 %v406_v56 }
  0xa6   :  { %251 = vmatpush.msra.mxu3 %v219_v9  ;;  %436 = vmatpush.msra.mxu1 %v403_v49 }
  0xa7   :  { %674 = vmatmul.msk.f32.gmra.mxu1 %vm155_vm1, %v154_v14  ;;  %v116_v14 = vadd.s32 16, %v1023_v27 }
  0xa8   :  { %437 = vmatpush.msra.mxu1 %v400_v47 }
  0xa9   :  { %vm117_vm5 = vcmp.eq.s32.totalorder %v116_v14, %v1025_v28 }
  0xb7   :  { %v303_v48 = vpop.trf.xlu0 }
  0xbf   :  { %v304_v50 = vpop.trf.xlu0 }
  0xc7   :  { %v305_v55 = vpop.trf.xlu0 }
  0xc8   :  { %679 = vmatpush.xpose.msk.msrb.mxu3 %vm229_vm3, %v305_v55 }
  0xcc   :  { %680 = vmatpush.xpose.msk.msrb.mxu3 %vm229_vm3, %v304_v50 }
  0xd0   :  { %681 = vmatpush.xpose.msk.msrb.mxu3 %vm229_vm3, %v303_v48 }
 0x11c   :  { %v185_v34 = vpop.f32.mrf.mxu1 }
 0x11d   :  { %v191_v35 = vsel %vm114_vm2, 1.0, %v185_v34 }
 0x11e   :  { %v193_v37 = vmul.f32 %v191_v35, %v1033_v32 }
 0x120   :  { %677 = vmatmul.msk.f32.vlgmr.msra.gmra.mxu3 %vm229_vm3, %v193_v37 }
 0x124   :  { %v188_v41 = vpop.f32.mrf.mxu1 }
 0x125   :  { %v192_v42 = vsel %vm115_vm4, 1.0, %v188_v41 }
 0x126   :  { %v194_v43 = vmul.f32 %v192_v42, %v1049_v40 }
 0x128   :  { %678 = vmatmul.msk.f32.gmra.mxu3 %vm229_vm3, %v194_v43 }
 0x1a3   :  { %v253_v52 = vpop.f32.mrf.mxu3 }
 0x1a4   :  { %v254_v53 = vadd.f32 %v706_v51, %v253_v52 }
 0x1a6   :  { %259 = vst [vmem:[#allocation9] sm:$0xff] %v254_v53  ;;  %v261_v54 = vmax.f32 %v254_v53, 0.0 }
 0x1a8   :  { %543 = vmatmul.f32.vlgmr.msrb.gmra.mxu0 %v261_v54 }
 0x1ab   :  { %v256_v57 = vpop.f32.mrf.mxu3 }
 0x1ac   :  { %v257_v58 = vadd.f32 %v706_v51, %v256_v57 }
 0x1ae   :  { %260 = vst [vmem:[#allocation9 + $0x8] sm:$0xff] %v257_v58  ;;  %v262_v59 = vmax.f32 %v257_v58, 0.0 }
 0x1b0   :  { %281 = vmatpush.xpose.msrb.mxu2 %v262_v59  ;;  %546 = vmatmul.f32.gmra.mxu0 %v262_v59 }
 0x1b4   :  { %282 = vmatpush.xpose.msrb.mxu2 %v261_v54 }
 0x1b7   :  { %283 = vmatmul.f32.vlgmr.msrb.gmra.mxu2 %v266_v60 }
 0x225   :  { %v544_v61 = vpop.f32.mrf.mxu0 }
 0x22d   :  { %v547_v62 = vpop.f32.mrf.mxu0 }
 0x22e   :  { %574 = vmatpush.msra.mxu3 %v547_v62 }
 0x230   :  { %575 = vmatpush.msra.mxu3 %v544_v61 }
 0x23a   :  { %v284_v63 = vpop.f32.mrf.mxu2 }
 0x23b   :  { %v319_v0 = vperm.slane %v284_v63, 0 }
 0x23d   :  { %v320_v1 = vmul.f32 %v319_v0, %v303_v48  ;;  %v321_v2 = vmul.f32 %v319_v0, %v304_v50  ;;  %v322_v3 = vmul.f32 %v319_v0, %v305_v55 }
 0x23f   :  { %682 = vmatmul.msk.f32.vlgmr.msrb.gmra.mxu3 %vm229_vm3, %v320_v1 }
 0x247   :  { %683 = vmatmul.msk.f32.gmra.mxu3 %vm229_vm3, %v321_v2 }
 0x24f   :  { %684 = vmatmul.msk.f32.gmra.mxu3 %vm229_vm3, %v322_v3 }
 0x2c2   :  { %v358_v7 = vpop.f32.mrf.mxu3 }
 0x2c3   :  { %v367_v8 = vsel %vm114_vm2, 1.0, %v358_v7 }
 0x2c4   :  { %v370_v9 = vmul.f32 %v367_v8, %v104_v5 }
 0x2c6   :  { %688 = vmatmul.msk.f32.vlgmr.msra.gmra.mxu1 %vm155_vm1, %v370_v9 }
 0x2ca   :  { %v361_v11 = vpop.f32.mrf.mxu3 }
 0x2cb   :  { %v368_v12 = vsel %vm115_vm4, 1.0, %v361_v11 }
 0x2cc   :  { %v371_v13 = vmul.f32 %v368_v12, %v105_v10 }
 0x2ce   :  { %689 = vmatmul.msk.f32.gmra.mxu1 %vm155_vm1, %v371_v13 }
 0x2d2   :  { %v364_v16 = vpop.f32.mrf.mxu3 }
 0x2d3   :  { %v369_v17 = vsel %vm117_vm5, 1.0, %v364_v16 }
 0x2d4   :  { %v372_v18 = vmul.f32 %v369_v17, %v106_v15 }
 0x2d6   :  { %690 = vmatmul.msk.f32.gmra.mxu1 %vm155_vm1, %v372_v18 }
 0x343   :  { %v439_v20 = vpop.f32.mrf.mxu1 }
 0x344   :  { %v440_v21 = vadd.f32 %v707_v19, %v439_v20 }
 0x346   :  { %448 = vst [vmem:[#allocation11] sm:$0xff] %v440_v21  ;;  %v451_v30 = vmax.f32 %v440_v21, 0.0 }
 0x34b   :  { %v442_v22 = vpop.f32.mrf.mxu1 }
 0x34c   :  { %v443_v23 = vadd.f32 %v707_v19, %v442_v22 }
 0x34e   :  { %449 = vst [vmem:[#allocation11 + $0x8] sm:$0xff] %v443_v23  ;;  %v452_v29 = vmax.f32 %v443_v23, 0.0 }
 0x353   :  { %v445_v24 = vpop.f32.mrf.mxu1 }
 0x354   :  { %v446_v25 = vadd.f32 %v707_v19, %v445_v24 }
 0x356   :  { %450 = vst [vmem:[#allocation11 + $0x10] sm:$0xff] %v446_v25  ;;  %v453_v26 = vmax.f32 %v446_v25, 0.0 }
 0x358   :  { %468 = vmatpush.xpose.msra.mxu2 %v453_v26 }
 0x35c   :  { %469 = vmatpush.xpose.msra.mxu2 %v452_v29 }
 0x360   :  { %470 = vmatpush.xpose.msra.mxu2 %v451_v30 }
 0x363   :  { %471 = vmatmul.f32.vlgmr.msra.gmra.mxu2 %v454_v31 }
 0x364   :  { %691 = vmatpush.xpose.msk.msrb.mxu2 %vm155_vm1, %v1001_v6 }
 0x368   :  { %692 = vmatpush.xpose.msk.msrb.mxu2 %vm155_vm1, %v994_v4 }
 0x3e6   :  { %v472_v33 = vpop.f32.mrf.mxu2 }
 0x3e7   :  { %v475_v34 = vperm.slane %v472_v33, 0 }
 0x3e9   :  { %v476_v35 = vmul.f32 %v475_v34, %v994_v4  ;;  %v477_v36 = vmul.f32 %v475_v34, %v1001_v6  ;;  %v708_v6 = vld [vmem:[%s1159_s13] ss:$0 sm:$0xff]  ;;  %s874_s13 = smov [#allocation9]  }
 0x3ea   :  { %s629_s30 = sshll.u32 %s874_s13, 4  ;;  %s630_s30 = int_to_ptr.vmem [resolvable:$true] %s629_s30 }
 0x3eb   :  { %693 = vmatmul.msk.f32.vlgmr.msrb.gmra.mxu2 %vm155_vm1, %v476_v35  ;;  %637 = dma.vmem_to_hbm [thread:$0]  %s630_s30, 256, %s632_s18, [#allocation10], %s871_s0, %s871_s0, %s872_s17  }
 0x3ec   :  { %650 = dma.vmem_to_hbm [thread:$0]  %s643_s1, 384, %s645_s21, [#allocation10], %s871_s0, %s871_s0, %s872_s17  }
 0x3f3   :  { %694 = vmatmul.msk.f32.gmra.mxu2 %vm155_vm1, %v477_v36 }
 0x46e   :  { %v501_v37 = vpop.f32.mrf.mxu2 }
 0x46f   :  { %v507_v39 = vsel %vm114_vm2, 1.0, %v501_v37 }
 0x470   :  { %v509_v41 = vmul.f32 %v507_v39, %v1033_v32 }
 0x472   :  { %695 = vmatmul.msk.f32.vlgmr.msra.gmra.mxu3 %vm229_vm3, %v509_v41 }
 0x476   :  { %v504_v42 = vpop.f32.mrf.mxu2 }
 0x477   :  { %v508_v4 = vsel %vm115_vm4, 1.0, %v504_v42 }
 0x478   :  { %v510_v43 = vmul.f32 %v508_v4, %v1049_v40 }
 0x47a   :  { %696 = vmatmul.msk.f32.gmra.mxu3 %vm229_vm3, %v510_v43 }
 0x4f5   :  { %v577_v44 = vpop.f32.mrf.mxu3 }
 0x4f6   :  { %v578_v27 = vadd.f32 %v708_v6, %v577_v44 }
 0x4f8   :  { %v584_v32 = vsel %vm583_vm6, %v578_v27, -1e+30 }
 0x4f9   :  { %586 = vmax.xlane.f32.xlu1 %v584_v32 }
 0x4fd   :  { %v580_v45 = vpop.f32.mrf.mxu3 }
 0x4fe   :  { %v581_v46 = vadd.f32 %v708_v6, %v580_v45 }
 0x500   :  { %v585_v38 = vsel %vm583_vm6, %v581_v46, -1e+30 }
 0x501   :  { %588 = vmax.xlane.f32.xlu1 %v585_v38 }
 0x56c   :  { %v587_v40 = vpop.xlane.xlu1 %586 }
 0x56d   :  { %v590_v47 = vsub.f32 %v578_v27, %v587_v40 }
 0x56f   :  { %v592_v48 = vsel %vm583_vm6, %v590_v47, -1e+30 }
 0x570   :  { %v594_v49 = vmul.f32 1.442695, %v592_v48 }
 0x572   :  { %709 = vpow2.f32 %v594_v49 }
 0x574   :  { %v589_v50 = vpop.xlane.xlu1 %588 }
 0x575   :  { %v591_v51 = vsub.f32 %v581_v46, %v589_v50 }
 0x577   :  { %v593_v52 = vsel %vm583_vm6, %v591_v51, -1e+30 }
 0x578   :  { %v710_v53 = vpop.eup %709  ;;  %v596_v54 = vmul.f32 1.442695, %v593_v52 }
 0x579   :  { %598 = vadd.xlane.f32.xlu2 %v710_v53 }
 0x57a   :  { %711 = vpow2.f32 %v596_v54 }
 0x580   :  { %v712_v55 = vpop.eup %711 }
 0x581   :  { %600 = vadd.xlane.f32.xlu2 %v712_v55 }
 0x5ec   :  { %v599_v56 = vpop.xlane.xlu2 %598 }
 0x5ed   :  { %713 = vlog2.f32 %v599_v56 }
 0x5f3   :  { %v714_v57 = vpop.eup %713 }
 0x5f4   :  { %v603_v58 = vmul.f32 0.6931472, %v714_v57  ;;  %v601_v59 = vpop.xlane.xlu2 %600 }
 0x5f5   :  { %715 = vlog2.f32 %v601_v59 }
 0x5f6   :  { %v606_v60 = vsub.f32 %v590_v47, %v603_v58 }
 0x5f8   :  { %v608_v61 = vsel %vm583_vm6, %v606_v60, 0.0 }
 0x5f9   :  { %610 = vst [vmem:[#allocation8] sm:$0xff] %v608_v61 }
 0x5fb   :  { %v716_v62 = vpop.eup %715 }
 0x5fc   :  { %v605_v63 = vmul.f32 0.6931472, %v716_v62 }
 0x5fe   :  { %v607_v0 = vsub.f32 %v591_v51, %v605_v63 }
 0x600   :  { %v609_v1 = vsel %vm583_vm6, %v607_v0, 0.0 }
 0x601   :  { %611 = vst [vmem:[#allocation8 + $0x8] sm:$0xff] %v609_v1 }
 0x602   :  { %624 = dma.vmem_to_hbm [thread:$0]  %s617_s16, 256, %s619_s7, [#allocation4], %s871_s0, %s871_s0, %s872_s17  }
 0x603   :  { %865 = dma.done.wait [#allocation4], 256  }
 0x604   :  { %866 = vsyncadd [#allocation4], 4294967040 }
 0x605   :  { %867 = dma.done.wait [#allocation10], 640  }
 0x606   :  { %868 = vsyncadd [#allocation10], 4294966656 }
 0x607   :  { %663 = vsyncpa [#allocation3], 1 }
 0x608   :  { %664 = vsyncpa [#allocation6], 1 }
 0x609   :  { %665 = vsyncpa [#allocation4], 1 }
 0x60a   :  { %666 = vsyncpa [#allocation10], 1 }

</bundles_post_ra>
